<compile_context>
chip_gen: v7x
topology: tpu7x:2x2x1
jax: 0.10.0
libtpu: 0.0.40
codegen_flags: <defaults>
</compile_context>

<pallas_src>
import jax
import jax.numpy as jnp
from jax import lax
from jax.experimental import pallas as pl
from jax.experimental.pallas import tpu as pltpu


_NEG_BIG = float(jnp.finfo(jnp.float32).min)   # mask value for padded T columns


def _make_kernel(t_total, t_block, needs_t_mask):
    """Build the fused score / online-softmax / pool kernel (static params)."""

    def kernel(q_ref, x_ref, o_ref, m_sc, l_sc, acc_sc):
        # q_ref:  (1, C, 1)   float32 query column
        # x_ref:  (bb, C, tT) input dtype
        # o_ref:  (bb, 1, C)  output block (written only on the last T step)
        # m_sc:   (bb, 1, 1)  running max          (f32 scratch)
        # l_sc:   (bb, 1, 1)  running denominator  (f32 scratch)
        # acc_sc: (bb, 1, C)  running pooled acc   (f32 scratch)
        t_idx = pl.program_id(1)

        @pl.when(t_idx == 0)
        def _init():
            m_sc[...] = jnp.full_like(m_sc, -jnp.inf)
            l_sc[...] = jnp.zeros_like(l_sc)
            acc_sc[...] = jnp.zeros_like(acc_sc)

        x = x_ref[...]                                   # (bb, C, tT)
        q = q_ref[...]                                   # (1, C, 1) f32

        if needs_t_mask:   # static flag: only the last T block can be partial
            col = lax.broadcasted_iota(jnp.int32, (1, 1, t_block), 2)
            valid = (col + t_idx * t_block) < t_total    # (1, 1, tT)
            x = jnp.where(valid, x, 0)                   # zero padded columns

        # score[b, 0, t] = sum_c x[b, c, t] * q[c]
        # (VPU multiply -- f32 via promotion -- + sublane reduce over C)
        s = jnp.sum(x * q, axis=1, keepdims=True)        # (bb, 1, tT) f32
        if needs_t_mask:
            s = jnp.where(valid, s, _NEG_BIG)            # exclude padding

        # ---- online (flash-style) softmax update over T tiles --------------
        m_prev = m_sc[...]
        m_new = jnp.maximum(m_prev, jnp.max(s, axis=-1, keepdims=True))
        alpha = jnp.exp(m_prev - m_new)                  # (bb, 1, 1)
        p = jnp.exp(s - m_new)                           # (bb, 1, tT)  (EUP)
        l_sc[...] = alpha * l_sc[...] + jnp.sum(p, axis=-1, keepdims=True)

        # pooled partial: sum_t x[b, c, t] * p[b, 0, t]  (MXU, f32 accumulate)
        part = jnp.einsum("bst,bct->bsc", p.astype(x.dtype), x,
                          preferred_element_type=jnp.float32,
                          precision=lax.Precision.HIGHEST)   # (bb, 1, C)
        acc_sc[...] = alpha * acc_sc[...] + part
        m_sc[...] = m_new

        @pl.when(t_idx == pl.num_programs(1) - 1)
        def _finalize():
            # Fold the softmax normalization into the (bb, C) output block.
            inv = pl.reciprocal(l_sc[...], approx=False)     # (bb, 1, 1)
            o_ref[...] = (acc_sc[...] * inv).astype(o_ref.dtype)

    return kernel


def _largest_divisor_leq(n, cap):
    cap = int(max(1, min(n, cap)))
    for d in range(cap, 0, -1):
        if n % d == 0:
            return d
    return 1


def attention_pool_1d(x, query, *, vmem_budget_bytes=24 * 1024 * 1024):
    """x: (B, C, T), query: (C,)  ->  pooled: (B, C) in x.dtype."""
    B, C, T = x.shape
    assert query.shape == (C,), (query.shape, C)
    itemsize = jnp.dtype(x.dtype).itemsize

    # ---- tile selection from a VMEM budget ---------------------------------
    # The x tile is double-buffered by the pipeline and the kernel holds up to
    # ~2 tile-sized temporaries, so keep the tile itself to ~1/4 of the budget.
    x_tile_budget = max(vmem_budget_bytes // 4, 1)
    bytes_per_col = C * itemsize                      # one T column of one row

    max_bb_full_t = x_tile_budget // max(bytes_per_col * T, 1)
    if max_bb_full_t >= 1:
        t_block = T                                   # whole T extent per step
        bb = _largest_divisor_leq(B, max_bb_full_t)
    else:
        bb = 1                                        # tile T (multiple of 128)
        t_block = max(128, (x_tile_budget // (bytes_per_col * 128)) * 128)
        if t_block >= T:
            t_block = T
    # Keep >= 2 steps on the parallel batch axis when possible (v7x: 2 TCs).
    if B > 1 and B // bb < 2:
        bb = _largest_divisor_leq(B, B // 2)

    grid_b = B // bb
    grid_t = pl.cdiv(T, t_block)
    needs_t_mask = (T % t_block) != 0

    q_col = query.astype(jnp.float32).reshape(1, C, 1)

    x_tile_bytes = bb * C * t_block * itemsize
    vmem_limit = int(min(128 * 1024 * 1024,
                         max(32 * 1024 * 1024, 6 * x_tile_bytes)))

    kernel = _make_kernel(T, t_block, needs_t_mask)

    flops = 4 * B * C * T + 6 * B * T
    bytes_accessed = x.size * itemsize + q_col.size * 4 + B * C * itemsize

    out = pl.pallas_call(
        kernel,
        out_shape=jax.ShapeDtypeStruct((B, 1, C), x.dtype),
        grid=(grid_b, grid_t),
        in_specs=[
            pl.BlockSpec((1, C, 1), lambda b, t: (0, 0, 0)),          # query
            pl.BlockSpec((bb, C, t_block), lambda b, t: (b, 0, t)),   # x tile
        ],
        out_specs=pl.BlockSpec((bb, 1, C), lambda b, t: (b, 0, 0)),
        scratch_shapes=[
            pltpu.VMEM((bb, 1, 1), jnp.float32),   # running max
            pltpu.VMEM((bb, 1, 1), jnp.float32),   # running denominator
            pltpu.VMEM((bb, 1, C), jnp.float32),   # running pooled accumulator
        ],
        compiler_params=pltpu.CompilerParams(
            dimension_semantics=("parallel", "arbitrary"),
            vmem_limit_bytes=vmem_limit),
        cost_estimate=pl.CostEstimate(
            flops=flops,
            transcendentals=B * T + B * grid_t,
            bytes_accessed=bytes_accessed),
    )(q_col, x)

    return out.reshape(B, C)


def attention_pool_1d_ref(x, query):
    """Pure-JAX reference mirroring the PyTorch forward (exact f32 math)."""
    scores = jnp.sum(x * query[None, :, None], axis=1)        # (B, T)
    weights = jax.nn.softmax(scores, axis=-1)                 # (B, T)
    return jnp.sum(x * weights[:, None, :], axis=-1)          # (B, C)


if __name__ == "__main__":
    key = jax.random.PRNGKey(0)
    k_x, k_q = jax.random.split(key)

    B, C, T = 2, 4, 16                      # x: (batch, in_channels, seq)
    x = jax.random.normal(k_x, (B, C, T), jnp.float32)
    # The PyTorch module initializes query to zeros; use a random
    # (deterministic) query so the softmax is non-trivial while keeping
    # identical forward semantics.
    query = jax.random.normal(k_q, (C,), jnp.float32)

    pooled = attention_pool_1d(x, query)
    jax.block_until_ready(pooled)
    assert pooled.shape == (B, C), pooled.shape

    ref = attention_pool_1d_ref(x, query)
    # Tolerance allows for MXU multi-pass f32 rounding in the pooled dot.
    assert jnp.allclose(pooled, ref, atol=5e-3, rtol=5e-3), (
        float(jnp.max(jnp.abs(pooled - ref))))

    print("KERNEL_OK")
</pallas_src>

<mosaic_0001>
module attributes {stable_mosaic.version = 11 : i64} {
  func.func @kernel(%arg0: i32, %arg1: i32, %arg2: memref<1x4x1xf32, #tpu.memory_space<vmem>>, %arg3: memref<1x4x16xf32, #tpu.memory_space<vmem>>, %arg4: memref<1x1x4xf32, #tpu.memory_space<vmem>>, %arg5: memref<1x1x1xf32, #tpu.memory_space<vmem>>, %arg6: memref<1x1x1xf32, #tpu.memory_space<vmem>>, %arg7: memref<1x1x4xf32, #tpu.memory_space<vmem>>) attributes {dimension_semantics = [#tpu.dimension_semantics<parallel>, #tpu.dimension_semantics<arbitrary>], iteration_bounds = array<i64: 2, 1>, scalar_prefetch = 0 : i64, scratch_operands = 3 : i64, tpu.core_type = #tpu.core_type<tc>, window_params = [{pipeline_mode = #tpu.pipeline_mode<synchronous>, transform_indices = @transform_0, window_bounds = array<i64: 1, 4, 1>}, {transform_indices = @transform_1, window_bounds = array<i64: 1, 4, 16>}, {transform_indices = @transform_2, window_bounds = array<i64: 1, 1, 4>}]} {
    %c0_i32 = arith.constant 0 : i32
    %0 = arith.cmpi eq, %arg1, %c0_i32 : i32
    %1 = arith.extui %0 : i1 to i32
    %c0_i32_0 = arith.constant 0 : i32
    %2 = arith.cmpi ne, %1, %c0_i32_0 : i32
    scf.if %2 {
      %cst_29 = arith.constant 0xFF800000 : f32
      %34 = vector.broadcast %cst_29 : f32 to vector<1x1x1xf32>
      %c0_30 = arith.constant 0 : index
      %c0_31 = arith.constant 0 : index
      %c0_32 = arith.constant 0 : index
      %35 = vector.load %arg5[%c0_30, %c0_31, %c0_32] : memref<1x1x1xf32, #tpu.memory_space<vmem>>, vector<1x1x1xf32>
      tpu.vector_store %arg5[%c0_30, %c0_31, %c0_32], %34 {strides = array<i32>} : memref<1x1x1xf32, #tpu.memory_space<vmem>>, vector<1x1x1xf32>,
      %cst_33 = arith.constant 0.000000e+00 : f32
      %36 = vector.broadcast %cst_33 : f32 to vector<1x1x1xf32>
      %c0_34 = arith.constant 0 : index
      %c0_35 = arith.constant 0 : index
      %c0_36 = arith.constant 0 : index
      %37 = vector.load %arg6[%c0_34, %c0_35, %c0_36] : memref<1x1x1xf32, #tpu.memory_space<vmem>>, vector<1x1x1xf32>
      tpu.vector_store %arg6[%c0_34, %c0_35, %c0_36], %36 {strides = array<i32>} : memref<1x1x1xf32, #tpu.memory_space<vmem>>, vector<1x1x1xf32>,
      %cst_37 = arith.constant 0.000000e+00 : f32
      %38 = vector.broadcast %cst_37 : f32 to vector<1x1x4xf32>
      %c0_38 = arith.constant 0 : index
      %c0_39 = arith.constant 0 : index
      %c0_40 = arith.constant 0 : index
      %39 = vector.load %arg7[%c0_38, %c0_39, %c0_40] : memref<1x1x4xf32, #tpu.memory_space<vmem>>, vector<1x1x4xf32>
      tpu.vector_store %arg7[%c0_38, %c0_39, %c0_40], %38 {strides = array<i32>} : memref<1x1x4xf32, #tpu.memory_space<vmem>>, vector<1x1x4xf32>,
    } else {
    }
    %c0 = arith.constant 0 : index
    %c0_1 = arith.constant 0 : index
    %c0_2 = arith.constant 0 : index
    %3 = vector.load %arg3[%c0, %c0_1, %c0_2] : memref<1x4x16xf32, #tpu.memory_space<vmem>>, vector<1x4x16xf32>
    %c0_3 = arith.constant 0 : index
    %c0_4 = arith.constant 0 : index
    %c0_5 = arith.constant 0 : index
    %4 = vector.load %arg2[%c0_3, %c0_4, %c0_5] : memref<1x4x1xf32, #tpu.memory_space<vmem>>, vector<1x4x1xf32>
    %5 = vector.broadcast %4 : vector<1x4x1xf32> to vector<1x4x16xf32>
    %6 = arith.mulf %3, %5 : vector<1x4x16xf32>
    %cst = arith.constant dense<0.000000e+00> : vector<1x16xf32>
    %7 = vector.multi_reduction <add>, %6, %cst [1] : vector<1x4x16xf32> to vector<1x16xf32>
    %8 = vector.shape_cast %7 : vector<1x16xf32> to vector<1x1x16xf32>
    %c0_6 = arith.constant 0 : index
    %c0_7 = arith.constant 0 : index
    %c0_8 = arith.constant 0 : index
    %9 = vector.load %arg5[%c0_6, %c0_7, %c0_8] : memref<1x1x1xf32, #tpu.memory_space<vmem>>, vector<1x1x1xf32>
    %cst_9 = arith.constant dense<0xFF800000> : vector<1x1xf32>
    %10 = vector.multi_reduction <maximumf>, %8, %cst_9 [2] : vector<1x1x16xf32> to vector<1x1xf32>
    %11 = vector.shape_cast %10 : vector<1x1xf32> to vector<1x1x1xf32>
    %12 = arith.maximumf %9, %11 : vector<1x1x1xf32>
    %13 = arith.subf %9, %12 : vector<1x1x1xf32>
    %14 = math.exp %13 : vector<1x1x1xf32>
    %15 = vector.broadcast %12 : vector<1x1x1xf32> to vector<1x1x16xf32>
    %16 = arith.subf %8, %15 : vector<1x1x16xf32>
    %17 = math.exp %16 : vector<1x1x16xf32>
    %c0_10 = arith.constant 0 : index
    %c0_11 = arith.constant 0 : index
    %c0_12 = arith.constant 0 : index
    %18 = vector.load %arg6[%c0_10, %c0_11, %c0_12] : memref<1x1x1xf32, #tpu.memory_space<vmem>>, vector<1x1x1xf32>
    %19 = arith.mulf %14, %18 : vector<1x1x1xf32>
    %cst_13 = arith.constant dense<0.000000e+00> : vector<1x1xf32>
    %20 = vector.multi_reduction <add>, %17, %cst_13 [2] : vector<1x1x16xf32> to vector<1x1xf32>
    %21 = vector.shape_cast %20 : vector<1x1xf32> to vector<1x1x1xf32>
    %22 = arith.addf %19, %21 : vector<1x1x1xf32>
    %c0_14 = arith.constant 0 : index
    %c0_15 = arith.constant 0 : index
    %c0_16 = arith.constant 0 : index
    %23 = vector.load %arg6[%c0_14, %c0_15, %c0_16] : memref<1x1x1xf32, #tpu.memory_space<vmem>>, vector<1x1x1xf32>
    tpu.vector_store %arg6[%c0_14, %c0_15, %c0_16], %22 {strides = array<i32>} : memref<1x1x1xf32, #tpu.memory_space<vmem>>, vector<1x1x1xf32>,
    "tpu.trace_start"() <{level = 10 : i32, message = "bst,bct->bsc"}> : () -> ()
    %cst_17 = arith.constant dense<0.000000e+00> : vector<1x1x4xf32>
    %24 = tpu.matmul %17, %3, %cst_17 {dimension_numbers = #tpu.dot_dimension_numbers<[2], [2], [1], [1], [0, 0, 0, 1, 1, 1], [0], [0]>, precision = #tpu.contract_precision<fp32>} : vector<1x1x16xf32>, vector<1x4x16xf32>, vector<1x1x4xf32> -> vector<1x1x4xf32>
    "tpu.trace_stop"() : () -> ()
    %c0_18 = arith.constant 0 : index
    %c0_19 = arith.constant 0 : index
    %c0_20 = arith.constant 0 : index
    %25 = vector.load %arg7[%c0_18, %c0_19, %c0_20] : memref<1x1x4xf32, #tpu.memory_space<vmem>>, vector<1x1x4xf32>
    %26 = vector.broadcast %14 : vector<1x1x1xf32> to vector<1x1x4xf32>
    %27 = arith.mulf %26, %25 : vector<1x1x4xf32>
    %28 = arith.addf %27, %24 : vector<1x1x4xf32>
    %c0_21 = arith.constant 0 : index
    %c0_22 = arith.constant 0 : index
    %c0_23 = arith.constant 0 : index
    %29 = vector.load %arg7[%c0_21, %c0_22, %c0_23] : memref<1x1x4xf32, #tpu.memory_space<vmem>>, vector<1x1x4xf32>
    tpu.vector_store %arg7[%c0_21, %c0_22, %c0_23], %28 {strides = array<i32>} : memref<1x1x4xf32, #tpu.memory_space<vmem>>, vector<1x1x4xf32>,
    %c0_24 = arith.constant 0 : index
    %c0_25 = arith.constant 0 : index
    %c0_26 = arith.constant 0 : index
    %30 = vector.load %arg5[%c0_24, %c0_25, %c0_26] : memref<1x1x1xf32, #tpu.memory_space<vmem>>, vector<1x1x1xf32>
    tpu.vector_store %arg5[%c0_24, %c0_25, %c0_26], %12 {strides = array<i32>} : memref<1x1x1xf32, #tpu.memory_space<vmem>>, vector<1x1x1xf32>,
    %c0_i32_27 = arith.constant 0 : i32
    %31 = arith.cmpi eq, %arg1, %c0_i32_27 : i32
    %32 = arith.extui %31 : i1 to i32
    %c0_i32_28 = arith.constant 0 : i32
    %33 = arith.cmpi ne, %32, %c0_i32_28 : i32
    scf.if %33 {
      %c0_29 = arith.constant 0 : index
      %c0_30 = arith.constant 0 : index
      %c0_31 = arith.constant 0 : index
      %34 = vector.load %arg6[%c0_29, %c0_30, %c0_31] : memref<1x1x1xf32, #tpu.memory_space<vmem>>, vector<1x1x1xf32>
      %35 = tpu.reciprocal %34 : vector<1x1x1xf32> -> vector<1x1x1xf32>
      %c0_32 = arith.constant 0 : index
      %c0_33 = arith.constant 0 : index
      %c0_34 = arith.constant 0 : index
      %36 = vector.load %arg7[%c0_32, %c0_33, %c0_34] : memref<1x1x4xf32, #tpu.memory_space<vmem>>, vector<1x1x4xf32>
      %37 = vector.broadcast %35 : vector<1x1x1xf32> to vector<1x1x4xf32>
      %38 = arith.mulf %36, %37 : vector<1x1x4xf32>
      %c0_35 = arith.constant 0 : index
      %c0_36 = arith.constant 0 : index
      %c0_37 = arith.constant 0 : index
      %39 = vector.load %arg4[%c0_35, %c0_36, %c0_37] : memref<1x1x4xf32, #tpu.memory_space<vmem>>, vector<1x1x4xf32>
      tpu.vector_store %arg4[%c0_35, %c0_36, %c0_37], %38 {strides = array<i32>} : memref<1x1x4xf32, #tpu.memory_space<vmem>>, vector<1x1x4xf32>,
    } else {
    }
    return
  }
  func.func @transform_0(%arg0: i32, %arg1: i32) -> (i32, i32, i32) {
    %c0_i32 = arith.constant 0 : i32
    %c0_i32_0 = arith.constant 0 : i32
    %c0_i32_1 = arith.constant 0 : i32
    %c0_i32_2 = arith.constant 0 : i32
    return %c0_i32, %c0_i32_0, %c0_i32_1 : i32, i32, i32
  }
  func.func @transform_1(%arg0: i32, %arg1: i32) -> (i32, i32, i32) {
    %c0_i32 = arith.constant 0 : i32
    %c0_i32_0 = arith.constant 0 : i32
    return %arg0, %c0_i32, %arg1 : i32, i32, i32
  }
  func.func @transform_2(%arg0: i32, %arg1: i32) -> (i32, i32, i32) {
    %c0_i32 = arith.constant 0 : i32
    %c0_i32_0 = arith.constant 0 : i32
    %c0_i32_1 = arith.constant 0 : i32
    return %arg0, %c0_i32, %c0_i32_0 : i32, i32, i32
  }
}

</mosaic_0001>

<bundles_post_ra>
// kernel: tpu_custom_call.1
= control target key start
LH: loop header
LB: loop body
LE: loop exit
PB: predicated region body
PF: predicated region fallthrough
CT: control target
= control target key end

     0   :  { %7 = vsyncpa [#allocation6], 0  ;;  %s1133_s0 = inlined_call_operand.vmem [shape: f32[1,4,1], index: 0, kind: input, shape index: {}]   ;;  %s1134_s1 = inlined_call_operand.vmem [shape: f32[2,4,16], index: 1, kind: input, shape index: {}]   ;;  %s1135_s2 = inlined_call_operand.hbm [shape: f32[2,1,4], index: 2, kind: output, shape index: {}]  }
   0x1   :  { %9 = vsyncpa [#allocation6 + $0x1], 0  ;;  %s996_s9 = smov 0   ;;  %s998_s10 = smov 0  }
   0x2   :  { %s1000_s11 = smov 0   ;;  %s1002_s12 = smov 0  }
   0x3   :  { %s1004_s13 = smov 0   ;;  %s1006_s14 = smov 0  }
   0x4 LB: > { %s778_s15 = sadd.s32 4294967295, %s974_s14   ;;  %s779_s16 = sadd.s32 4294967294, %s974_s14   ;;  %s974_s14 = sphi %s1006_s14, %s15_s14   ;;  %s970_s13 = sphi %s1004_s13, %s1142_s13   ;;  %s966_s12 = sphi %s1002_s12, %s1141_s12   ;;  %s962_s11 = sphi %s1000_s11, %s1140_s11   ;;  %s958_s10 = sphi %s998_s10, %s1139_s10   ;;  %s954_s9 = sphi %s996_s9, %s1138_s9  }
   0x5   : > { %s27_s17 = sadd.s32 1, %s970_s13  ;;  %s83_s18 = sadd.s32 1, %s962_s11 }
   0x6   : > { %p29_p0 = scmp.ge.s32.totalorder %s27_s17, 2  ;;  %p93_p1 = scmp.ne.s32.totalorder %s962_s11, %s958_s10 }
   0x7   : > { %p94_p2 = scmp.eq.s32.totalorder %s778_s15, 1  ;;  %p99_p3 = scmp.ne.s32.totalorder %s958_s10, %s954_s9 }
   0x8   : > { %s1144_s17 = smov (%p29_p0, %s27_s17), 0  ;;  %p100_p5 = scmp.eq.s32.totalorder %s779_s16, 1 }
   0x9   : > { %p1036_p4 = por %p94_p2, %p93_p1  ;;  %s80_s20 = ssub.s32 %s970_s13, %s1144_s17 }
   0xa   : > { %p782_p6 = scmp.ge.s32.totalorder %s974_s14, 1  ;;  %p81_p7 = scmp.eq.s32.totalorder %s80_s20, 0 }
   0xb   : > { %p1043_p8 = por %p100_p5, %p99_p3  ;;  %p131_p9 = scmp.lt.s32.totalorder %s974_s14, 3 }
   0xc   : > { %s1049_s22 = scalar_select %p81_p7, %s962_s11, %s83_s18  }
   0xd   : > { %p132_p10 = pnand %p782_p6, %p131_p9 }
   0xe   : > { %v171_v0 = vld [vmem:[%s1133_s0] sm:$0xf] (!%p132_p10)  ;;  %v976_v1 = vmov (!%p132_p10), 0   ;;  %vm165_vm0 = vcmask (!%p132_p10), 0   ;;  %v977_v2 = vmov (!%p132_p10), -inf   ;;  %p154_p11 = scmp.lt.s32.totalorder (!%p132_p10), %s966_s12, 1  ;;  %v200_v27 = vlaneseq (!%p132_p10) }
   0xf   : > { %135 = sbr.rel (%p132_p10) target bundleno = 759 (0x2f7), region = 28  ;;  %888 = vset.pattern.permute.xlu0 (!%p132_p10), %v976_v1  ;;  %889 = vset.pattern.permute.xlu1 (!%p132_p10), %v976_v1  ;;  %166 = vst.msk [vmem:[#allocation2] sm:$0x1] (!%p132_p10), %vm165_vm0, %v977_v2  ;;  %vm178_vm1 = vcmask (!%p132_p10), 125952   ;;  %vm187_vm2 = vcmask (!%p132_p10), 130048   ;;  %v978_v16 = vmov (!%p132_p10), 0.0  }
  0x10   : > { %174 = vperm.xlu0 (!%p132_p10), %888, %v171_v0   ;;  %167 = vst.msk [vmem:[#allocation3] sm:$0x1] (!%p132_p10), %vm165_vm0, %v978_v16  ;;  %804 = vmatprep.subr.mxu1 (!%p132_p10), %v978_v16  ;;  %vm168_vm3 = vcmask (!%p132_p10), 24576   ;;  %vm979_vm4 = vmmov (!%p132_p10), 0   ;;  %v201_v28 = vshrl.u32 (!%p132_p10), %v200_v27, 7  ;;  %s152_s30 = sand.u32 (!%p132_p10), 1, %s958_s10  }
  0x11   : > { %799 = vmatprep.subr.mxu0 (!%p132_p10), %v978_v16  ;;  %169 = vst.msk [vmem:[#allocation4] sm:$0x1] (!%p132_p10), %vm168_vm3, %v978_v16  ;;  %806 = vmatprep.mubr.msk.f32.mxu1 (!%p132_p10), %vm979_vm4, %v978_v16  ;;  %s784_s3 = sshll.u32 (!%p132_p10), %s966_s12, 4  ;;  %s153_s4 = scalar_lea.vmem (!%p132_p10), [#allocation5], %s152_s30 }
  0x12   : > { %801 = vmatprep.mubr.msk.f32.mxu0 (!%p132_p10), %vm979_vm4, %v978_v16  ;;  %v1067_v29 = vsub.s32 (!%p132_p10), 0, %v201_v28  ;;  %s712_s5 = sshll.u32 (!%p132_p10), %s153_s4, 4  ;;  %s1085_s8 = scalar_lea.hbm (!%p132_p10), %s1135_s2, %s784_s3  ;;  %s1087_s5 = int_to_ptr.vmem [resolvable:$true] %s712_s5 }
  0x13   : > { %s700_s15 = scalar_lea.sflag (!%p132_p10), [#allocation6], %s152_s30  ;;  %s980_s16 = smov (!%p132_p10), [#allocation5]  }
  0x14   : > { %s900_s18 = sshll.u32 (!%p132_p10), %s980_s16, 4  ;;  %s901_s18 = int_to_ptr.vmem [resolvable:$false] %s900_s18 }
  0x15   : > { %s902_s20 = scalar_lea.vmem (!%p132_p10), %s901_s18, 32  ;;  %p903_p1 = scmp.lt.s32.totalorder (!%p132_p10), %s1087_s5, %s901_s18 }
  0x16   : > { %s155_s25 = scalar_select %p154_p11, %s966_s12, 1  ;;  %v186_v17 = vld [vmem:[#allocation2] sm:$0x1] }
  0x17   : > { %v207_v42 = vld [vmem:[#allocation3] sm:$0x1]  ;;  %s896_s12 = scalar_lea.vmem %s1087_s5, 16 }
  0x18   : > { %s783_s26 = sshll.u32 %s155_s25, 2  ;;  %v667_v63 = vld [vmem:[#allocation4] sm:$0x1]  ;;  %p897_p12 = scmp.ne.s32.totalorder %s1087_s5, %s896_s12 }
  0x19   : > { %s160_s29 = scalar_lea.vmem %s1134_s1, %s783_s26  ;;  %p904_p2 = scmp.lt.s32.totalorder %s902_s20, %s896_s12 }
  0x1a   : > { %v170_v3 = vld [vmem:[%s160_s29] sm:$0xf]  ;;  %p898_p13 = pnand %p897_p12, %p1036_p4 }
  0x1b   : > { %v219_v14 = vsel %vm187_vm2, %v170_v3, 0  ;;  %p905_p3 = por %p904_p2, %p903_p1 }
  0x1c   : > { %v222_v15 = vand.u32 4294901760, %v219_v14  ;;  %p899_p0 = pneg %p898_p13 }
  0x1e   : > { %800 = vmatpush3.xpose.msra.mxu0 %v222_v15  ;;  %v299_v22 = vsub.f32 %v219_v14, %v222_v15  ;;  %p906_p5 = pnand %p905_p3, %p899_p0 }
  0x1f   : > { %809 = vmatprep.subr.mxu0 %v978_v16 }
  0x20   : > { %v300_v23 = vand.u32 4294901760, %v299_v22 }
  0x22   : > { %v301_v24 = vsub.f32 %v299_v22, %v300_v23 }
  0x24   : > { %v302_v26 = vand.u32 4294901760, %v301_v24 }
  0x26   : > { %805 = vmatpush3.xpose.msra.mxu1 %v302_v26 }
  0x27   : > { %814 = vmatprep.subr.mxu1 %v978_v16 }
  0x8f   : > { %v175_v4 = vpop.permute.xlu0 %174 }
  0x90   : > { %v177_v5 = vmul.f32 %v175_v4, %v170_v3 }
  0x92   : > { %v179_v6 = vsel %vm178_vm1, %v177_v5, 0.0 }
  0x93   : > { %v180_v7 = vrot.slane %v179_v6, 4 }
  0x95   : > { %v181_v8 = vadd.f32 %v180_v7, %v179_v6 }
  0x97   : > { %v182_v9 = vrot.slane %v181_v8, 2 }
  0x99   : > { %v183_v10 = vadd.f32 %v182_v9, %v181_v8 }
  0x9b   : > { %v184_v11 = vrot.slane %v183_v10, 1 }
  0x9d   : > { %v185_v12 = vadd.f32 %v184_v11, %v183_v10 }
  0x9f   : > { %v188_v13 = vsel %vm187_vm2, %v185_v12, -inf }
  0xa0   : > { %189 = vmax.xlane.f32.xlu0 %v188_v13 }
 0x12d   : > { %v190_v18 = vpop.xlane.xlu0 %189 }
 0x12e   : > { %v191_v19 = vmax.f32 %v186_v17, %v190_v18 }
 0x130   : > { %v192_v20 = vsub.f32 %v186_v17, %v191_v19  ;;  %681 = vst.msk [vmem:[#allocation2] sm:$0x1] %vm165_vm0, %v191_v19  ;;  %197 = vperm.xlu1 %889, %v191_v19  }
 0x132   : > { %v193_v21 = vmul.f32 1.442695, %v192_v20 }
 0x134   : > { %890 = vpow2.f32 %v193_v21 }
 0x13e   : > { %v891_v25 = vpop.eup %890 }
 0x13f   : > { %670 = vperm.xlu0 %888, %v891_v25   ;;  %v208_v43 = vmul.f32 %v891_v25, %v207_v42 }
 0x1af   : > { %v198_v30 = vpop.permute.xlu1 %197 }
 0x1b0   : > { %v203_v31 = vrot.slane %v198_v30, %v1067_v29 }
 0x1b2   : > { %v204_v32 = vsub.f32 %v185_v12, %v203_v31 }
 0x1b4   : > { %v205_v33 = vmul.f32 1.442695, %v204_v32 }
 0x1b6   : > { %892 = vpow2.f32 %v205_v33 }
 0x1be   : > { %v671_v57 = vpop.permute.xlu0 %670 }
 0x1bf   : > { %v676_v61 = vrot.slane %v671_v57, %v1067_v29 }
 0x1c0   : > { %v893_v34 = vpop.eup %892 }
 0x1c1   : > { %v209_v35 = vsel %vm187_vm2, %v893_v34, 0.0  ;;  %v216_v36 = vsel %vm187_vm2, %v893_v34, 0  ;;  %v677_v3 = vmul.f32 %v676_v61, %v667_v63 }
 0x1c2   : > { %210 = vadd.xlane.f32.xlu1 %v209_v35  ;;  %v287_v37 = vand.u32 4294901760, %v216_v36 }
 0x1c4   : > { %v288_v38 = vsub.f32 %v216_v36, %v287_v37  ;;  %807 = vmatmul.mubr.f32.vlgmr.msra.gmra.mrb[0].mxu1 %v287_v37 }
 0x1c5   : > { %815 = vmatpush3.xpose.msra.mxu1 %v222_v15  ;;  %816 = vmatprep.mubr.msk.f32.mxu1 %vm979_vm4, %v978_v16 }
 0x1c6   : > { %v289_v39 = vand.u32 4294901760, %v288_v38  ;;  %824 = vmatprep.subr.mxu1 %v978_v16 }
 0x1c8   : > { %817 = vmatmul.mubr.f32.vlgmr.msra.gmra.mrb[2].mxu1 %v289_v39  ;;  %v290_v40 = vsub.f32 %v288_v38, %v289_v39 }
 0x1c9   : > { %825 = vmatpush3.xpose.msra.mxu1 %v222_v15  ;;  %826 = vmatprep.mubr.msk.f32.mxu1 %vm979_vm4, %v978_v16 }
 0x1ca   : > { %v291_v41 = vand.u32 4294901760, %v290_v40 }
 0x1cc   : > { %802 = vmatmul.mubr.f32.vlgmr.msra.gmra.mrb[0].mxu0 %v291_v41  ;;  %827 = vmatmul.mubr.f32.vlgmr.msra.gmra.mrb[4].mxu1 %v287_v37 }
 0x1cd   : > { %810 = vmatpush3.xpose.msra.mxu0 %v299_v22  ;;  %811 = vmatprep.mubr.msk.f32.mxu0 %vm979_vm4, %v978_v16 }
 0x1ce   : > { %819 = vmatprep.subr.mxu0 %v978_v16 }
 0x1d0   : > { %812 = vmatmul.mubr.f32.vlgmr.msra.gmra.mrb[2].mxu0 %v288_v38 }
 0x1d1   : > { %820 = vmatpush3.xpose.msra.mxu0 %v300_v23  ;;  %821 = vmatprep.mubr.msk.f32.mxu0 %vm979_vm4, %v978_v16 }
 0x1d4   : > { %822 = vmatmul.mubr.f32.vlgmr.msra.gmra.mrb[4].mxu0 %v287_v37 }
 0x24f   : > { %v211_v44 = vpop.xlane.xlu1 %210 }
 0x250   : > { %v212_v45 = vadd.f32 %v211_v44, %v208_v43 }
 0x252   : > { %214 = vst.msk [vmem:[#allocation3] sm:$0x1] %vm165_vm0, %v212_v45 }
 0x259   : > { %v685_v46 = vld [vmem:[#allocation3] sm:$0x1] }
 0x25a   : > { %894 = vrcp.f32 %v685_v46 }
 0x264   : > { %v895_v47 = vpop.eup %894 }
 0x265   : > { %690 = vperm.xlu1 %889, %v895_v47  }
 0x297   : > { %v369_v48 = vpop.f32.mrb[0].mxu1 }
 0x298   : > { %v808_v49 = vpop.f32.mrb[1].mxu1 }
 0x29b   : > { %v517_v50 = vpop.f32.mrb[2].mxu1 }
 0x29c   : > { %v818_v51 = vpop.f32.mrb[3].mxu1 }
 0x29f   : > { %v293_v52 = vpop.f32.mrb[0].mxu0  ;;  %v663_v53 = vpop.f32.mrb[4].mxu1 }
 0x2a0   : > { %v370_v54 = vadd.f32 %v369_v48, %v293_v52  ;;  %v803_v55 = vpop.f32.mrb[1].mxu0  ;;  %v828_v56 = vpop.f32.mrb[5].mxu1 }
 0x2a3   : > { %v443_v58 = vpop.f32.mrb[2].mxu0 }
 0x2a4   : > { %v444_v59 = vadd.f32 %v443_v58, %v370_v54  ;;  %v813_v60 = vpop.f32.mrb[3].mxu0 }
 0x2a6   : > { %v518_v62 = vadd.f32 %v517_v50, %v444_v59 }
 0x2a7   : > { %v591_v0 = vpop.f32.mrb[4].mxu0 }
 0x2a8   : > { %v592_v1 = vadd.f32 %v591_v0, %v518_v62  ;;  %v823_v2 = vpop.f32.mrb[5].mxu0 }
 0x2aa   : > { %v664_v4 = vadd.f32 %v663_v53, %v592_v1 }
 0x2ac   : > { %v678_v5 = vadd.f32 %v677_v3, %v664_v4 }
 0x2ae   : > { %680 = vst.msk [vmem:[#allocation4] sm:$0x1] %vm168_vm3, %v678_v5 }
 0x2b5   : > { %v687_v8 = vld [vmem:[#allocation4] sm:$0x1] }
 0x2e4   : > { %v691_v6 = vpop.permute.xlu1 %690 }
 0x2e5   : > { %v696_v7 = vrot.slane %v691_v6, %v1067_v29 }
 0x2e7   : > { %v697_v9 = vmul.f32 %v696_v7, %v687_v8 }
 0x2e9   : > { %698 = vst.msk [vmem:[%s153_s4] sm:$0x1] %vm168_vm3, %v697_v9 }
 0x2ea   : > { %909 = shalt.err (!%p906_p5)
}
 0x2eb   : > { %s910_s23 = scalar_lea.hbm %s1085_s8, 16  ;;  %s914_s26 = scalar_lea.hbm %s1135_s2, 32 }
 0x2ec   : > { %p911_p6 = scmp.ne.s32.totalorder %s1085_s8, %s910_s23  ;;  %p915_p10 = scmp.lt.u32.totalorder %s1085_s8, %s1135_s2 }
 0x2ed   : > { %p916_p11 = scmp.lt.u32.totalorder %s914_s26, %s910_s23  ;;  %p918_p13 = scmp.lt.u32.totalorder %s910_s23, %s1085_s8 }
 0x2ee   : > { %p912_p7 = pnand %p911_p6, %p1036_p4 }
 0x2ef   : > { %p917_p12 = por %p916_p11, %p915_p10 }
 0x2f0   : > { %p913_p9 = pneg %p912_p7 }
 0x2f1   : > { %p919_p0 = por %p918_p13, %p917_p12 }
 0x2f3   : > { %p920_p1 = pnand %p919_p0, %p913_p9 }
 0x2f5   : > { %923 = shalt.err (!%p920_p1)
}
 0x2f6   : > { %829 = dma.vmem_to_hbm [thread:$0]  (%p1036_p4), %s1087_s5, 16, %s1085_s8, %s700_s15  }
 0x2f7 PF: > { %p835_p2 = scmp.ge.s32.totalorder %s974_s14, 2  ;;  %s724_s29 = sand.u32 1, %s954_s9  }
 0x2f8   : > { %s725_s30 = scalar_lea.sflag [#allocation6], %s724_s29 }
 0x2f9   : > { %p832_p3 = pnand %p835_p2, %p1043_p8 }
 0x2fb   : > { %949 = dma.done.wait (!%p832_p3), %s725_s30, 16  }
 0x2fc   : > { %951 = vsyncadd (!%p832_p3), %s725_s30, 4294967280  ;;  %s15_s14 = sadd.s32 1, %s974_s14   ;;  %s1138_s9 = smov %s958_s10 }
 0x2fd   : > { %p12_p5 = scmp.ge.s32.totalorder %s15_s14, 4   ;;  %s1139_s10 = smov %s962_s11 }
 0x2fe   : > { %s1140_s11 = smov %s1049_s22  ;;  %s1141_s12 = smov %s970_s13 }
 0x2ff   : > { %s1142_s13 = smov %s1144_s17  ;;  %14 = sbr.rel (!%p12_p5) target bundleno = 4 (0x4), region = 71 }
 0x306   :  { %729 = vsyncpa [#allocation6], 1 }
 0x307   :  { %731 = vsyncpa [#allocation6 + $0x1], 1 }

</bundles_post_ra>
